<compile_context>
chip_gen: v7x
topology: tpu7x:2x2x1
jax: 0.10.0
libtpu: 0.0.40
codegen_flags: <defaults>
</compile_context>

<pallas_src>
import math
import functools

import jax
import jax.numpy as jnp
from jax.experimental import pallas as pl
from jax.experimental.pallas import tpu as pltpu


def _embedding_gather_kernel(ids_ref, table_hbm, out_ref, row_buf, copy_sems,
                             *, scale, tm):
    # ids_ref:   (N,)            int32, SMEM (scalar prefetch)
    # table_hbm: (vocab, d)      f32, stays in HBM (memory_space=pl.ANY)
    # out_ref:   (tm, d)         f32, VMEM output tile
    # row_buf:   (tm, d)         f32, VMEM scratch for gathered rows
    # copy_sems: (tm,)           DMA semaphores
    base = pl.program_id(0) * tm

    # Issue all row-gather DMAs for this tile, then wait; the copies overlap.
    copies = []
    for t in range(tm):  # tm is a small compile-time constant -> static unroll
        row = ids_ref[base + t]
        cp = pltpu.make_async_copy(
            table_hbm.at[pl.ds(row, 1), :],
            row_buf.at[pl.ds(t, 1), :],
            copy_sems.at[t],
        )
        cp.start()
        copies.append(cp)
    for cp in copies:
        cp.wait()

    out_ref[...] = row_buf[...] * scale


def embeddings_forward(x_ids, table, *, tm=8):
    """x_ids: (B, S) integer token ids; table: (vocab, d_model) f32.
    Returns (B, S, d_model) f32 = table[x_ids] * sqrt(d_model)."""
    B, S = x_ids.shape
    vocab, d_model = table.shape
    N = B * S
    assert N % tm == 0, "token count must be divisible by the tile size"
    scale = float(math.sqrt(d_model))

    # ids live in SMEM as scalars used only for indexing; clamp for safety
    # (out-of-range ids would otherwise make the DMA gather read OOB).
    ids_flat = jnp.clip(x_ids.reshape(N).astype(jnp.int32), 0, vocab - 1)

    out_flat = pl.pallas_call(
        functools.partial(_embedding_gather_kernel, scale=scale, tm=tm),
        out_shape=jax.ShapeDtypeStruct((N, d_model), table.dtype),
        grid_spec=pltpu.PrefetchScalarGridSpec(
            num_scalar_prefetch=1,            # ids -> SMEM, visible to index_maps
            grid=(N // tm,),
            in_specs=[
                pl.BlockSpec(memory_space=pl.ANY),   # full table stays in HBM
            ],
            out_specs=pl.BlockSpec((tm, d_model), lambda i, ids: (i, 0)),
            scratch_shapes=[
                pltpu.VMEM((tm, d_model), table.dtype),   # gathered rows
                pltpu.SemaphoreType.DMA((tm,)),           # one sem per row DMA
            ],
        ),
        compiler_params=pltpu.CompilerParams(
            dimension_semantics=("parallel",)),
    )(ids_flat, table)

    return out_flat.reshape(B, S, d_model)


if __name__ == "__main__":
    # Small, deterministic setup. d_model=128 keeps the output tile lane-dense.
    B, S = 2, 8          # batch, sequence length
    vocab, d_model = 64, 128

    key = jax.random.PRNGKey(0)
    k_tab, k_ids = jax.random.split(key)

    # nn.Embedding default init: weight ~ N(0, 1)
    table = jax.random.normal(k_tab, (vocab, d_model), dtype=jnp.float32)
    x_ids = jax.random.randint(k_ids, (B, S), 0, vocab, dtype=jnp.int32)

    out = embeddings_forward(x_ids, table, tm=8)
    out = jax.block_until_ready(out)

    # Reference check against plain-JAX gather.
    ref = table[x_ids] * math.sqrt(d_model)
    assert out.shape == (B, S, d_model)
    assert jnp.allclose(out, ref, atol=1e-5, rtol=1e-5)

    print("KERNEL_OK")
</pallas_src>

<mosaic_0001>
module attributes {stable_mosaic.version = 11 : i64} {
  func.func @_embedding_gather_kernel(%arg0: i32, %arg1: memref<16xi32, #tpu.memory_space<smem>>, %arg2: memref<64x128xf32, #tpu.memory_space<any>>, %arg3: memref<8x128xf32, #tpu.memory_space<vmem>>, %arg4: memref<8x128xf32, #tpu.memory_space<vmem>>, %arg5: memref<8x!tpu.dma_semaphore, #tpu.memory_space<semaphore_mem>>) attributes {dimension_semantics = [#tpu.dimension_semantics<parallel>], iteration_bounds = array<i64: 2>, scalar_prefetch = 1 : i64, scratch_operands = 2 : i64, tpu.core_type = #tpu.core_type<tc>, window_params = [{}, {transform_indices = @transform_1, window_bounds = array<i64: 8, 128>}]} {
    %c8_i32 = arith.constant 8 : i32
    %0 = arith.muli %arg0, %c8_i32 : i32
    %c0_i32 = arith.constant 0 : i32
    %1 = arith.addi %0, %c0_i32 : i32
    %2 = arith.index_cast %1 : i32 to index
    %3 = memref.load %arg1[%2] : memref<16xi32, #tpu.memory_space<smem>>
    %c0_i32_0 = arith.constant 0 : i32
    %c0_i32_1 = arith.constant 0 : i32
    %4 = tpu.memref_slice %arg2[%3, %c0_i32_1] : memref<64x128xf32, #tpu.memory_space<any>> -> memref<1x128xf32, #tpu.memory_space<any>>
    %c0_i32_2 = arith.constant 0 : i32
    %c0_i32_3 = arith.constant 0 : i32
    %5 = tpu.memref_slice %arg4[%c0_i32_2, %c0_i32_3] : memref<8x128xf32, #tpu.memory_space<vmem>> -> memref<1x128xf32, #tpu.memory_space<vmem>>
    %6 = tpu.memref_slice %arg5[%c0_i32_0] : memref<8x!tpu.dma_semaphore, #tpu.memory_space<semaphore_mem>> -> memref<1x!tpu.dma_semaphore, #tpu.memory_space<semaphore_mem>>
    %7 = tpu.memref_squeeze %6 : memref<1x!tpu.dma_semaphore, #tpu.memory_space<semaphore_mem>> -> memref<!tpu.dma_semaphore, #tpu.memory_space<semaphore_mem>>
    tpu.enqueue_dma source(%4 : memref<1x128xf32, #tpu.memory_space<any>>) target(%5 : memref<1x128xf32, #tpu.memory_space<vmem>>) target_semaphore(%7 : memref<!tpu.dma_semaphore, #tpu.memory_space<semaphore_mem>>)
    %c1_i32 = arith.constant 1 : i32
    %8 = arith.addi %0, %c1_i32 : i32
    %9 = arith.index_cast %8 : i32 to index
    %10 = memref.load %arg1[%9] : memref<16xi32, #tpu.memory_space<smem>>
    %c1_i32_4 = arith.constant 1 : i32
    %c0_i32_5 = arith.constant 0 : i32
    %11 = tpu.memref_slice %arg2[%10, %c0_i32_5] : memref<64x128xf32, #tpu.memory_space<any>> -> memref<1x128xf32, #tpu.memory_space<any>>
    %c1_i32_6 = arith.constant 1 : i32
    %c0_i32_7 = arith.constant 0 : i32
    %12 = tpu.memref_slice %arg4[%c1_i32_6, %c0_i32_7] : memref<8x128xf32, #tpu.memory_space<vmem>> -> memref<1x128xf32, #tpu.memory_space<vmem>>
    %13 = tpu.memref_slice %arg5[%c1_i32_4] : memref<8x!tpu.dma_semaphore, #tpu.memory_space<semaphore_mem>> -> memref<1x!tpu.dma_semaphore, #tpu.memory_space<semaphore_mem>>
    %14 = tpu.memref_squeeze %13 : memref<1x!tpu.dma_semaphore, #tpu.memory_space<semaphore_mem>> -> memref<!tpu.dma_semaphore, #tpu.memory_space<semaphore_mem>>
    tpu.enqueue_dma source(%11 : memref<1x128xf32, #tpu.memory_space<any>>) target(%12 : memref<1x128xf32, #tpu.memory_space<vmem>>) target_semaphore(%14 : memref<!tpu.dma_semaphore, #tpu.memory_space<semaphore_mem>>)
    %c2_i32 = arith.constant 2 : i32
    %15 = arith.addi %0, %c2_i32 : i32
    %16 = arith.index_cast %15 : i32 to index
    %17 = memref.load %arg1[%16] : memref<16xi32, #tpu.memory_space<smem>>
    %c2_i32_8 = arith.constant 2 : i32
    %c0_i32_9 = arith.constant 0 : i32
    %18 = tpu.memref_slice %arg2[%17, %c0_i32_9] : memref<64x128xf32, #tpu.memory_space<any>> -> memref<1x128xf32, #tpu.memory_space<any>>
    %c2_i32_10 = arith.constant 2 : i32
    %c0_i32_11 = arith.constant 0 : i32
    %19 = tpu.memref_slice %arg4[%c2_i32_10, %c0_i32_11] : memref<8x128xf32, #tpu.memory_space<vmem>> -> memref<1x128xf32, #tpu.memory_space<vmem>>
    %20 = tpu.memref_slice %arg5[%c2_i32_8] : memref<8x!tpu.dma_semaphore, #tpu.memory_space<semaphore_mem>> -> memref<1x!tpu.dma_semaphore, #tpu.memory_space<semaphore_mem>>
    %21 = tpu.memref_squeeze %20 : memref<1x!tpu.dma_semaphore, #tpu.memory_space<semaphore_mem>> -> memref<!tpu.dma_semaphore, #tpu.memory_space<semaphore_mem>>
    tpu.enqueue_dma source(%18 : memref<1x128xf32, #tpu.memory_space<any>>) target(%19 : memref<1x128xf32, #tpu.memory_space<vmem>>) target_semaphore(%21 : memref<!tpu.dma_semaphore, #tpu.memory_space<semaphore_mem>>)
    %c3_i32 = arith.constant 3 : i32
    %22 = arith.addi %0, %c3_i32 : i32
    %23 = arith.index_cast %22 : i32 to index
    %24 = memref.load %arg1[%23] : memref<16xi32, #tpu.memory_space<smem>>
    %c3_i32_12 = arith.constant 3 : i32
    %c0_i32_13 = arith.constant 0 : i32
    %25 = tpu.memref_slice %arg2[%24, %c0_i32_13] : memref<64x128xf32, #tpu.memory_space<any>> -> memref<1x128xf32, #tpu.memory_space<any>>
    %c3_i32_14 = arith.constant 3 : i32
    %c0_i32_15 = arith.constant 0 : i32
    %26 = tpu.memref_slice %arg4[%c3_i32_14, %c0_i32_15] : memref<8x128xf32, #tpu.memory_space<vmem>> -> memref<1x128xf32, #tpu.memory_space<vmem>>
    %27 = tpu.memref_slice %arg5[%c3_i32_12] : memref<8x!tpu.dma_semaphore, #tpu.memory_space<semaphore_mem>> -> memref<1x!tpu.dma_semaphore, #tpu.memory_space<semaphore_mem>>
    %28 = tpu.memref_squeeze %27 : memref<1x!tpu.dma_semaphore, #tpu.memory_space<semaphore_mem>> -> memref<!tpu.dma_semaphore, #tpu.memory_space<semaphore_mem>>
    tpu.enqueue_dma source(%25 : memref<1x128xf32, #tpu.memory_space<any>>) target(%26 : memref<1x128xf32, #tpu.memory_space<vmem>>) target_semaphore(%28 : memref<!tpu.dma_semaphore, #tpu.memory_space<semaphore_mem>>)
    %c4_i32 = arith.constant 4 : i32
    %29 = arith.addi %0, %c4_i32 : i32
    %30 = arith.index_cast %29 : i32 to index
    %31 = memref.load %arg1[%30] : memref<16xi32, #tpu.memory_space<smem>>
    %c4_i32_16 = arith.constant 4 : i32
    %c0_i32_17 = arith.constant 0 : i32
    %32 = tpu.memref_slice %arg2[%31, %c0_i32_17] : memref<64x128xf32, #tpu.memory_space<any>> -> memref<1x128xf32, #tpu.memory_space<any>>
    %c4_i32_18 = arith.constant 4 : i32
    %c0_i32_19 = arith.constant 0 : i32
    %33 = tpu.memref_slice %arg4[%c4_i32_18, %c0_i32_19] : memref<8x128xf32, #tpu.memory_space<vmem>> -> memref<1x128xf32, #tpu.memory_space<vmem>>
    %34 = tpu.memref_slice %arg5[%c4_i32_16] : memref<8x!tpu.dma_semaphore, #tpu.memory_space<semaphore_mem>> -> memref<1x!tpu.dma_semaphore, #tpu.memory_space<semaphore_mem>>
    %35 = tpu.memref_squeeze %34 : memref<1x!tpu.dma_semaphore, #tpu.memory_space<semaphore_mem>> -> memref<!tpu.dma_semaphore, #tpu.memory_space<semaphore_mem>>
    tpu.enqueue_dma source(%32 : memref<1x128xf32, #tpu.memory_space<any>>) target(%33 : memref<1x128xf32, #tpu.memory_space<vmem>>) target_semaphore(%35 : memref<!tpu.dma_semaphore, #tpu.memory_space<semaphore_mem>>)
    %c5_i32 = arith.constant 5 : i32
    %36 = arith.addi %0, %c5_i32 : i32
    %37 = arith.index_cast %36 : i32 to index
    %38 = memref.load %arg1[%37] : memref<16xi32, #tpu.memory_space<smem>>
    %c5_i32_20 = arith.constant 5 : i32
    %c0_i32_21 = arith.constant 0 : i32
    %39 = tpu.memref_slice %arg2[%38, %c0_i32_21] : memref<64x128xf32, #tpu.memory_space<any>> -> memref<1x128xf32, #tpu.memory_space<any>>
    %c5_i32_22 = arith.constant 5 : i32
    %c0_i32_23 = arith.constant 0 : i32
    %40 = tpu.memref_slice %arg4[%c5_i32_22, %c0_i32_23] : memref<8x128xf32, #tpu.memory_space<vmem>> -> memref<1x128xf32, #tpu.memory_space<vmem>>
    %41 = tpu.memref_slice %arg5[%c5_i32_20] : memref<8x!tpu.dma_semaphore, #tpu.memory_space<semaphore_mem>> -> memref<1x!tpu.dma_semaphore, #tpu.memory_space<semaphore_mem>>
    %42 = tpu.memref_squeeze %41 : memref<1x!tpu.dma_semaphore, #tpu.memory_space<semaphore_mem>> -> memref<!tpu.dma_semaphore, #tpu.memory_space<semaphore_mem>>
    tpu.enqueue_dma source(%39 : memref<1x128xf32, #tpu.memory_space<any>>) target(%40 : memref<1x128xf32, #tpu.memory_space<vmem>>) target_semaphore(%42 : memref<!tpu.dma_semaphore, #tpu.memory_space<semaphore_mem>>)
    %c6_i32 = arith.constant 6 : i32
    %43 = arith.addi %0, %c6_i32 : i32
    %44 = arith.index_cast %43 : i32 to index
    %45 = memref.load %arg1[%44] : memref<16xi32, #tpu.memory_space<smem>>
    %c6_i32_24 = arith.constant 6 : i32
    %c0_i32_25 = arith.constant 0 : i32
    %46 = tpu.memref_slice %arg2[%45, %c0_i32_25] : memref<64x128xf32, #tpu.memory_space<any>> -> memref<1x128xf32, #tpu.memory_space<any>>
    %c6_i32_26 = arith.constant 6 : i32
    %c0_i32_27 = arith.constant 0 : i32
    %47 = tpu.memref_slice %arg4[%c6_i32_26, %c0_i32_27] : memref<8x128xf32, #tpu.memory_space<vmem>> -> memref<1x128xf32, #tpu.memory_space<vmem>>
    %48 = tpu.memref_slice %arg5[%c6_i32_24] : memref<8x!tpu.dma_semaphore, #tpu.memory_space<semaphore_mem>> -> memref<1x!tpu.dma_semaphore, #tpu.memory_space<semaphore_mem>>
    %49 = tpu.memref_squeeze %48 : memref<1x!tpu.dma_semaphore, #tpu.memory_space<semaphore_mem>> -> memref<!tpu.dma_semaphore, #tpu.memory_space<semaphore_mem>>
    tpu.enqueue_dma source(%46 : memref<1x128xf32, #tpu.memory_space<any>>) target(%47 : memref<1x128xf32, #tpu.memory_space<vmem>>) target_semaphore(%49 : memref<!tpu.dma_semaphore, #tpu.memory_space<semaphore_mem>>)
    %c7_i32 = arith.constant 7 : i32
    %50 = arith.addi %0, %c7_i32 : i32
    %51 = arith.index_cast %50 : i32 to index
    %52 = memref.load %arg1[%51] : memref<16xi32, #tpu.memory_space<smem>>
    %c7_i32_28 = arith.constant 7 : i32
    %c0_i32_29 = arith.constant 0 : i32
    %53 = tpu.memref_slice %arg2[%52, %c0_i32_29] : memref<64x128xf32, #tpu.memory_space<any>> -> memref<1x128xf32, #tpu.memory_space<any>>
    %c7_i32_30 = arith.constant 7 : i32
    %c0_i32_31 = arith.constant 0 : i32
    %54 = tpu.memref_slice %arg4[%c7_i32_30, %c0_i32_31] : memref<8x128xf32, #tpu.memory_space<vmem>> -> memref<1x128xf32, #tpu.memory_space<vmem>>
    %55 = tpu.memref_slice %arg5[%c7_i32_28] : memref<8x!tpu.dma_semaphore, #tpu.memory_space<semaphore_mem>> -> memref<1x!tpu.dma_semaphore, #tpu.memory_space<semaphore_mem>>
    %56 = tpu.memref_squeeze %55 : memref<1x!tpu.dma_semaphore, #tpu.memory_space<semaphore_mem>> -> memref<!tpu.dma_semaphore, #tpu.memory_space<semaphore_mem>>
    tpu.enqueue_dma source(%53 : memref<1x128xf32, #tpu.memory_space<any>>) target(%54 : memref<1x128xf32, #tpu.memory_space<vmem>>) target_semaphore(%56 : memref<!tpu.dma_semaphore, #tpu.memory_space<semaphore_mem>>)
    %c0_i32_32 = arith.constant 0 : i32
    %c0_i32_33 = arith.constant 0 : i32
    %57 = tpu.memref_slice %arg2[%3, %c0_i32_33] : memref<64x128xf32, #tpu.memory_space<any>> -> memref<1x128xf32, #tpu.memory_space<any>>
    %c0_i32_34 = arith.constant 0 : i32
    %c0_i32_35 = arith.constant 0 : i32
    %58 = tpu.memref_slice %arg4[%c0_i32_34, %c0_i32_35] : memref<8x128xf32, #tpu.memory_space<vmem>> -> memref<1x128xf32, #tpu.memory_space<vmem>>
    %59 = tpu.memref_slice %arg5[%c0_i32_32] : memref<8x!tpu.dma_semaphore, #tpu.memory_space<semaphore_mem>> -> memref<1x!tpu.dma_semaphore, #tpu.memory_space<semaphore_mem>>
    %60 = tpu.memref_squeeze %59 : memref<1x!tpu.dma_semaphore, #tpu.memory_space<semaphore_mem>> -> memref<!tpu.dma_semaphore, #tpu.memory_space<semaphore_mem>>
    tpu.wait_dma2 semaphore(%60 : memref<!tpu.dma_semaphore, #tpu.memory_space<semaphore_mem>>) src(%57 : memref<1x128xf32, #tpu.memory_space<any>>) dst(%58 : memref<1x128xf32, #tpu.memory_space<vmem>>)
    %c1_i32_36 = arith.constant 1 : i32
    %c0_i32_37 = arith.constant 0 : i32
    %61 = tpu.memref_slice %arg2[%10, %c0_i32_37] : memref<64x128xf32, #tpu.memory_space<any>> -> memref<1x128xf32, #tpu.memory_space<any>>
    %c1_i32_38 = arith.constant 1 : i32
    %c0_i32_39 = arith.constant 0 : i32
    %62 = tpu.memref_slice %arg4[%c1_i32_38, %c0_i32_39] : memref<8x128xf32, #tpu.memory_space<vmem>> -> memref<1x128xf32, #tpu.memory_space<vmem>>
    %63 = tpu.memref_slice %arg5[%c1_i32_36] : memref<8x!tpu.dma_semaphore, #tpu.memory_space<semaphore_mem>> -> memref<1x!tpu.dma_semaphore, #tpu.memory_space<semaphore_mem>>
    %64 = tpu.memref_squeeze %63 : memref<1x!tpu.dma_semaphore, #tpu.memory_space<semaphore_mem>> -> memref<!tpu.dma_semaphore, #tpu.memory_space<semaphore_mem>>
    tpu.wait_dma2 semaphore(%64 : memref<!tpu.dma_semaphore, #tpu.memory_space<semaphore_mem>>) src(%61 : memref<1x128xf32, #tpu.memory_space<any>>) dst(%62 : memref<1x128xf32, #tpu.memory_space<vmem>>)
    %c2_i32_40 = arith.constant 2 : i32
    %c0_i32_41 = arith.constant 0 : i32
    %65 = tpu.memref_slice %arg2[%17, %c0_i32_41] : memref<64x128xf32, #tpu.memory_space<any>> -> memref<1x128xf32, #tpu.memory_space<any>>
    %c2_i32_42 = arith.constant 2 : i32
    %c0_i32_43 = arith.constant 0 : i32
    %66 = tpu.memref_slice %arg4[%c2_i32_42, %c0_i32_43] : memref<8x128xf32, #tpu.memory_space<vmem>> -> memref<1x128xf32, #tpu.memory_space<vmem>>
    %67 = tpu.memref_slice %arg5[%c2_i32_40] : memref<8x!tpu.dma_semaphore, #tpu.memory_space<semaphore_mem>> -> memref<1x!tpu.dma_semaphore, #tpu.memory_space<semaphore_mem>>
    %68 = tpu.memref_squeeze %67 : memref<1x!tpu.dma_semaphore, #tpu.memory_space<semaphore_mem>> -> memref<!tpu.dma_semaphore, #tpu.memory_space<semaphore_mem>>
    tpu.wait_dma2 semaphore(%68 : memref<!tpu.dma_semaphore, #tpu.memory_space<semaphore_mem>>) src(%65 : memref<1x128xf32, #tpu.memory_space<any>>) dst(%66 : memref<1x128xf32, #tpu.memory_space<vmem>>)
    %c3_i32_44 = arith.constant 3 : i32
    %c0_i32_45 = arith.constant 0 : i32
    %69 = tpu.memref_slice %arg2[%24, %c0_i32_45] : memref<64x128xf32, #tpu.memory_space<any>> -> memref<1x128xf32, #tpu.memory_space<any>>
    %c3_i32_46 = arith.constant 3 : i32
    %c0_i32_47 = arith.constant 0 : i32
    %70 = tpu.memref_slice %arg4[%c3_i32_46, %c0_i32_47] : memref<8x128xf32, #tpu.memory_space<vmem>> -> memref<1x128xf32, #tpu.memory_space<vmem>>
    %71 = tpu.memref_slice %arg5[%c3_i32_44] : memref<8x!tpu.dma_semaphore, #tpu.memory_space<semaphore_mem>> -> memref<1x!tpu.dma_semaphore, #tpu.memory_space<semaphore_mem>>
    %72 = tpu.memref_squeeze %71 : memref<1x!tpu.dma_semaphore, #tpu.memory_space<semaphore_mem>> -> memref<!tpu.dma_semaphore, #tpu.memory_space<semaphore_mem>>
    tpu.wait_dma2 semaphore(%72 : memref<!tpu.dma_semaphore, #tpu.memory_space<semaphore_mem>>) src(%69 : memref<1x128xf32, #tpu.memory_space<any>>) dst(%70 : memref<1x128xf32, #tpu.memory_space<vmem>>)
    %c4_i32_48 = arith.constant 4 : i32
    %c0_i32_49 = arith.constant 0 : i32
    %73 = tpu.memref_slice %arg2[%31, %c0_i32_49] : memref<64x128xf32, #tpu.memory_space<any>> -> memref<1x128xf32, #tpu.memory_space<any>>
    %c4_i32_50 = arith.constant 4 : i32
    %c0_i32_51 = arith.constant 0 : i32
    %74 = tpu.memref_slice %arg4[%c4_i32_50, %c0_i32_51] : memref<8x128xf32, #tpu.memory_space<vmem>> -> memref<1x128xf32, #tpu.memory_space<vmem>>
    %75 = tpu.memref_slice %arg5[%c4_i32_48] : memref<8x!tpu.dma_semaphore, #tpu.memory_space<semaphore_mem>> -> memref<1x!tpu.dma_semaphore, #tpu.memory_space<semaphore_mem>>
    %76 = tpu.memref_squeeze %75 : memref<1x!tpu.dma_semaphore, #tpu.memory_space<semaphore_mem>> -> memref<!tpu.dma_semaphore, #tpu.memory_space<semaphore_mem>>
    tpu.wait_dma2 semaphore(%76 : memref<!tpu.dma_semaphore, #tpu.memory_space<semaphore_mem>>) src(%73 : memref<1x128xf32, #tpu.memory_space<any>>) dst(%74 : memref<1x128xf32, #tpu.memory_space<vmem>>)
    %c5_i32_52 = arith.constant 5 : i32
    %c0_i32_53 = arith.constant 0 : i32
    %77 = tpu.memref_slice %arg2[%38, %c0_i32_53] : memref<64x128xf32, #tpu.memory_space<any>> -> memref<1x128xf32, #tpu.memory_space<any>>
    %c5_i32_54 = arith.constant 5 : i32
    %c0_i32_55 = arith.constant 0 : i32
    %78 = tpu.memref_slice %arg4[%c5_i32_54, %c0_i32_55] : memref<8x128xf32, #tpu.memory_space<vmem>> -> memref<1x128xf32, #tpu.memory_space<vmem>>
    %79 = tpu.memref_slice %arg5[%c5_i32_52] : memref<8x!tpu.dma_semaphore, #tpu.memory_space<semaphore_mem>> -> memref<1x!tpu.dma_semaphore, #tpu.memory_space<semaphore_mem>>
    %80 = tpu.memref_squeeze %79 : memref<1x!tpu.dma_semaphore, #tpu.memory_space<semaphore_mem>> -> memref<!tpu.dma_semaphore, #tpu.memory_space<semaphore_mem>>
    tpu.wait_dma2 semaphore(%80 : memref<!tpu.dma_semaphore, #tpu.memory_space<semaphore_mem>>) src(%77 : memref<1x128xf32, #tpu.memory_space<any>>) dst(%78 : memref<1x128xf32, #tpu.memory_space<vmem>>)
    %c6_i32_56 = arith.constant 6 : i32
    %c0_i32_57 = arith.constant 0 : i32
    %81 = tpu.memref_slice %arg2[%45, %c0_i32_57] : memref<64x128xf32, #tpu.memory_space<any>> -> memref<1x128xf32, #tpu.memory_space<any>>
    %c6_i32_58 = arith.constant 6 : i32
    %c0_i32_59 = arith.constant 0 : i32
    %82 = tpu.memref_slice %arg4[%c6_i32_58, %c0_i32_59] : memref<8x128xf32, #tpu.memory_space<vmem>> -> memref<1x128xf32, #tpu.memory_space<vmem>>
    %83 = tpu.memref_slice %arg5[%c6_i32_56] : memref<8x!tpu.dma_semaphore, #tpu.memory_space<semaphore_mem>> -> memref<1x!tpu.dma_semaphore, #tpu.memory_space<semaphore_mem>>
    %84 = tpu.memref_squeeze %83 : memref<1x!tpu.dma_semaphore, #tpu.memory_space<semaphore_mem>> -> memref<!tpu.dma_semaphore, #tpu.memory_space<semaphore_mem>>
    tpu.wait_dma2 semaphore(%84 : memref<!tpu.dma_semaphore, #tpu.memory_space<semaphore_mem>>) src(%81 : memref<1x128xf32, #tpu.memory_space<any>>) dst(%82 : memref<1x128xf32, #tpu.memory_space<vmem>>)
    %c7_i32_60 = arith.constant 7 : i32
    %c0_i32_61 = arith.constant 0 : i32
    %85 = tpu.memref_slice %arg2[%52, %c0_i32_61] : memref<64x128xf32, #tpu.memory_space<any>> -> memref<1x128xf32, #tpu.memory_space<any>>
    %c7_i32_62 = arith.constant 7 : i32
    %c0_i32_63 = arith.constant 0 : i32
    %86 = tpu.memref_slice %arg4[%c7_i32_62, %c0_i32_63] : memref<8x128xf32, #tpu.memory_space<vmem>> -> memref<1x128xf32, #tpu.memory_space<vmem>>
    %87 = tpu.memref_slice %arg5[%c7_i32_60] : memref<8x!tpu.dma_semaphore, #tpu.memory_space<semaphore_mem>> -> memref<1x!tpu.dma_semaphore, #tpu.memory_space<semaphore_mem>>
    %88 = tpu.memref_squeeze %87 : memref<1x!tpu.dma_semaphore, #tpu.memory_space<semaphore_mem>> -> memref<!tpu.dma_semaphore, #tpu.memory_space<semaphore_mem>>
    tpu.wait_dma2 semaphore(%88 : memref<!tpu.dma_semaphore, #tpu.memory_space<semaphore_mem>>) src(%85 : memref<1x128xf32, #tpu.memory_space<any>>) dst(%86 : memref<1x128xf32, #tpu.memory_space<vmem>>)
    %c0 = arith.constant 0 : index
    %c0_64 = arith.constant 0 : index
    %89 = vector.load %arg4[%c0, %c0_64] : memref<8x128xf32, #tpu.memory_space<vmem>>, vector<8x128xf32>
    %cst = arith.constant 11.3137083 : f32
    %90 = vector.broadcast %cst : f32 to vector<8x128xf32>
    %91 = arith.mulf %89, %90 : vector<8x128xf32>
    %c0_65 = arith.constant 0 : index
    %c0_66 = arith.constant 0 : index
    %92 = vector.load %arg3[%c0_65, %c0_66] : memref<8x128xf32, #tpu.memory_space<vmem>>, vector<8x128xf32>
    tpu.vector_store %arg3[%c0_65, %c0_66], %91 {strides = array<i32>} : memref<8x128xf32, #tpu.memory_space<vmem>>, vector<8x128xf32>,
    return
  }
  func.func @transform_1(%arg0: i32, %arg1: memref<16xi32, #tpu.memory_space<smem>>) -> (i32, i32) {
    %c0_i32 = arith.constant 0 : i32
    %c0_i32_0 = arith.constant 0 : i32
    return %arg0, %c0_i32 : i32, i32
  }
}

</mosaic_0001>

<bundles_post_ra>
// kernel: tpu_custom_call.1
= control target key start
LH: loop header
LB: loop body
LE: loop exit
PB: predicated region body
PF: predicated region fallthrough
CT: control target
= control target key end

     0   :  { %s927_s0 = inlined_call_operand.hbm [shape: s32[16], index: 0, kind: input, shape index: {}]   ;;  %s928_s1 = inlined_call_operand.hbm [shape: f32[64,128], index: 1, kind: input, shape index: {}]   ;;  %s929_s2 = inlined_call_operand.hbm [shape: f32[16,128], index: 2, kind: output, shape index: {}]  }
   0x1   :  { %s399_s11 = scalar_lea.hbm %s927_s0, 16 }
   0x2   :  { %p400_p0 = scmp.ne.s32.totalorder %s927_s0, %s399_s11  ;;  %p403_p1 = scmp.lt.u32.totalorder %s399_s11, %s927_s0 }
   0x4   :  { %p405_p2 = pnand %p403_p1, %p400_p0 }
   0x6   :  { %408 = shalt.err (!%p405_p2)  }
   0x7   :  { %s675_s16 = smov [#allocation5]  }
   0x8   :  { %8 = dma.hbm_to_smem %s927_s0, 16, %s675_s16, [#allocation4] }
   0x9   :  { %641 = dma.done.wait [#allocation4], 16 }
   0xa   :  { %642 = vsyncadd [#allocation4], 4294967280 }
   0xb   :  { %10 = sfence }
   0xc   :  { %11 = vsyncpa [#allocation7], 0 }
   0xd   :  { %13 = vsyncpa [#allocation7 + $0x1], 0  ;;  %s712_s19 = smov 0   ;;  %s714_s20 = smov 0  }
   0xe   :  { %s716_s21 = smov 0  }
   0xf LB: > { %s334_s0 = sadd.s32 4294967295, %s673_s21   ;;  %s729_s22 = sadd.s32 1, %s673_s21   ;;  %s673_s21 = sphi %s716_s21, %s934_s21   ;;  %s669_s20 = sphi %s714_s20, %s933_s20   ;;  %s665_s19 = sphi %s712_s19, %s932_s19  }
  0x10   : > { %s22_s23 = ssub.s32 %s673_s21, %s729_s22  ;;  %s25_s24 = sadd.s32 1, %s669_s20 }
  0x11   : > { %p23_p3 = scmp.eq.s32.totalorder %s22_s23, 0  ;;  %p335_p4 = scmp.ne.s32.totalorder %s22_s23, 0 }
  0x12   : > { %p29_p5 = scmp.eq.s32.totalorder %s673_s21, 1  ;;  %p34_p6 = scmp.ne.s32.totalorder %s669_s20, %s665_s19 }
  0x13   : > { %s738_s25 = scalar_select %p23_p3, %s669_s20, %s25_s24  }
  0x14   : > { %p740_p7 = por %p335_p4, %p29_p5  ;;  %p35_p8 = scmp.eq.s32.totalorder %s334_s0, 1 }
  0x15   : > { %p336_p10 = scmp.ge.s32.totalorder %s673_s21, 2 }
  0x16   : > { %p744_p9 = por %p35_p8, %p34_p6  ;;  %s49_s28 = sand.u32 (!%p336_p10), 1, %s669_s20  }
  0x17   : > { %44 = sbr.rel (%p336_p10) target bundleno = 244 (0xf4), region = 12  ;;  %s751_s29 = sshll.u32 (!%p336_p10), %s673_s21, 3 }
  0x18   : > { %s755_s30 = sshll.u32 (!%p336_p10), %s49_s28, 3  ;;  %s53_s3 = sld [smem:[#allocation5 + %s751_s29]] (!%p336_p10) }
  0x19   : > { %s676_s4 = smov (!%p336_p10), [#allocation2]   ;;  %s67_s6 = sadd.s32 (!%p336_p10), 1, %s751_s29 }
  0x1a   : > { %s63_s5 = sshll.u32 (!%p336_p10), %s676_s4, 4  ;;  %s761_s7 = sld [smem:[#allocation5 + %s67_s6]] (!%p336_p10)  ;;  %s759_s5 = int_to_ptr.vmem [resolvable:$true] %s63_s5 }
  0x1b   : > { %s84_s8 = sadd.s32 (!%p336_p10), 2, %s751_s29  ;;  %s677_s9 = smov (!%p336_p10), [#allocation2 + $0x1]  }
  0x1c   : > { %s80_s10 = sshll.u32 (!%p336_p10), %s677_s9, 4  ;;  %s764_s11 = sld [smem:[#allocation5 + %s84_s8]] (!%p336_p10)  ;;  %s766_s10 = int_to_ptr.vmem [resolvable:$true] %s80_s10 }
  0x1d   : > { %s774_s0 = scalar_lea.hbm (!%p336_p10), %s928_s1, 1024 }
  0x1e   : > { %s339_s12 = sshll.u32 %s53_s3, 4 }
  0x1f   : > { %s55_s15 = scalar_lea.hbm %s928_s1, %s339_s12 }
  0x20   : > { %s409_s16 = scalar_lea.hbm %s55_s15, 16  ;;  %p412_p12 = scmp.lt.u32.totalorder %s55_s15, %s928_s1 }
  0x21   : > { %p410_p11 = scmp.ne.s32.totalorder %s55_s15, %s409_s16  ;;  %p413_p13 = scmp.lt.u32.totalorder %s774_s0, %s409_s16 }
  0x22   : > { %p415_p1 = scmp.lt.u32.totalorder %s409_s16, %s55_s15 }
  0x23   : > { %p414_p0 = por %p413_p13, %p412_p12 }
  0x25   : > { %p416_p2 = por %p415_p1, %p414_p0 }
  0x27   : > { %p417_p3 = pnand %p416_p2, %p410_p11 }
  0x29   : > { %420 = shalt.err (!%p417_p3)  }
  0x2a   : > { %s421_s3 = scalar_lea.vmem %s759_s5, 16  ;;  %s783_s4 = scalar_lea.vmem %s759_s5, 128 }
  0x2b   : > { %p422_p4 = scmp.ne.s32.totalorder %s759_s5, %s421_s3  ;;  %p426_p5 = scmp.lt.s32.totalorder %s759_s5, %s759_s5 }
  0x2c   : > { %p427_p6 = scmp.lt.s32.totalorder %s783_s4, %s421_s3 }
  0x2e   : > { %p428_p8 = por %p427_p6, %p426_p5 }
  0x30   : > { %p429_p10 = pnand %p428_p8, %p422_p4 }
  0x32   : > { %432 = shalt.err (!%p429_p10)  }
  0x33   : > { %66 = dma.hbm_to_vmem [thread:$0]  %s55_s15, 16, %s759_s5, [#allocation3] }
  0x34   : > { %s340_s6 = sshll.u32 %s761_s7, 4  ;;  %s678_s8 = smov [#allocation2 + $0x2]  }
  0x35   : > { %s97_s9 = sshll.u32 %s678_s8, 4  ;;  %s70_s14 = scalar_lea.hbm %s928_s1, %s340_s6  ;;  %s793_s9 = int_to_ptr.vmem [resolvable:$true] %s97_s9 }
  0x36   : > { %s433_s16 = scalar_lea.hbm %s70_s14, 16  ;;  %p436_p12 = scmp.lt.u32.totalorder %s70_s14, %s928_s1 }
  0x37   : > { %p434_p11 = scmp.ne.s32.totalorder %s70_s14, %s433_s16  ;;  %p437_p13 = scmp.lt.u32.totalorder %s774_s0, %s433_s16 }
  0x38   : > { %p439_p1 = scmp.lt.u32.totalorder %s433_s16, %s70_s14 }
  0x39   : > { %p438_p0 = por %p437_p13, %p436_p12 }
  0x3b   : > { %p440_p2 = por %p439_p1, %p438_p0 }
  0x3d   : > { %p441_p3 = pnand %p440_p2, %p434_p11 }
  0x3f   : > { %444 = shalt.err (!%p441_p3)  }
  0x40   : > { %s445_s7 = scalar_lea.vmem %s766_s10, 16  ;;  %p450_p5 = scmp.lt.s32.totalorder %s766_s10, %s759_s5 }
  0x41   : > { %p446_p4 = scmp.ne.s32.totalorder %s766_s10, %s445_s7  ;;  %p451_p6 = scmp.lt.s32.totalorder %s783_s4, %s445_s7 }
  0x43   : > { %p452_p8 = por %p451_p6, %p450_p5 }
  0x45   : > { %p453_p10 = pnand %p452_p8, %p446_p4 }
  0x47   : > { %456 = shalt.err (!%p453_p10)  }
  0x48   : > { %83 = dma.hbm_to_vmem [thread:$0]  %s70_s14, 16, %s766_s10, [#allocation3 + $0x1] }
  0x49   : > { %s341_s15 = sshll.u32 %s764_s11, 4  ;;  %s101_s23 = sadd.s32 3, %s751_s29 }
  0x4a   : > { %s87_s6 = scalar_lea.hbm %s928_s1, %s341_s15  ;;  %s810_s8 = sld [smem:[#allocation5 + %s101_s23]] }
  0x4b   : > { %s457_s12 = scalar_lea.hbm %s87_s6, 16  ;;  %p460_p12 = scmp.lt.u32.totalorder %s87_s6, %s928_s1 }
  0x4c   : > { %p458_p11 = scmp.ne.s32.totalorder %s87_s6, %s457_s12  ;;  %p461_p13 = scmp.lt.u32.totalorder %s774_s0, %s457_s12 }
  0x4d   : > { %p463_p1 = scmp.lt.u32.totalorder %s457_s12, %s87_s6 }
  0x4e   : > { %p462_p0 = por %p461_p13, %p460_p12 }
  0x50   : > { %p464_p2 = por %p463_p1, %p462_p0 }
  0x52   : > { %p465_p3 = pnand %p464_p2, %p458_p11 }
  0x54   : > { %468 = shalt.err (!%p465_p3)  }
  0x55   : > { %s469_s10 = scalar_lea.vmem %s793_s9, 16  ;;  %p474_p5 = scmp.lt.s32.totalorder %s793_s9, %s759_s5 }
  0x56   : > { %p470_p4 = scmp.ne.s32.totalorder %s793_s9, %s469_s10  ;;  %p475_p6 = scmp.lt.s32.totalorder %s783_s4, %s469_s10 }
  0x58   : > { %p476_p8 = por %p475_p6, %p474_p5 }
  0x5a   : > { %p477_p10 = pnand %p476_p8, %p470_p4 }
  0x5c   : > { %480 = shalt.err (!%p477_p10)  }
  0x5d   : > { %100 = dma.hbm_to_vmem [thread:$0]  %s87_s6, 16, %s793_s9, [#allocation3 + $0x2] }
  0x5e   : > { %s118_s11 = sadd.s32 4, %s751_s29  ;;  %s679_s14 = smov [#allocation2 + $0x3]  }
  0x5f   : > { %s114_s17 = sshll.u32 %s679_s14, 4  ;;  %s119_s18 = sld [smem:[#allocation5 + %s118_s11]]  ;;  %s115_s17 = int_to_ptr.vmem [resolvable:$true] %s114_s17 }
  0x60   : > { %s680_s7 = smov [#allocation2 + $0x4]   ;;  %s135_s23 = sadd.s32 5, %s751_s29 }
  0x61   : > { %s131_s15 = sshll.u32 %s680_s7, 4  ;;  %s342_s24 = sshll.u32 %s810_s8, 4  ;;  %s825_s15 = int_to_ptr.vmem [resolvable:$true] %s131_s15 }
  0x62   : > { %s104_s13 = scalar_lea.hbm %s928_s1, %s342_s24  ;;  %s830_s16 = sld [smem:[#allocation5 + %s135_s23]] }
  0x63   : > { %s481_s10 = scalar_lea.hbm %s104_s13, 16  ;;  %p484_p12 = scmp.lt.u32.totalorder %s104_s13, %s928_s1 }
  0x64   : > { %p482_p11 = scmp.ne.s32.totalorder %s104_s13, %s481_s10  ;;  %p485_p13 = scmp.lt.u32.totalorder %s774_s0, %s481_s10 }
  0x65   : > { %p487_p1 = scmp.lt.u32.totalorder %s481_s10, %s104_s13 }
  0x66   : > { %p486_p0 = por %p485_p13, %p484_p12 }
  0x68   : > { %p488_p2 = por %p487_p1, %p486_p0 }
  0x6a   : > { %p489_p3 = pnand %p488_p2, %p482_p11 }
  0x6c   : > { %492 = shalt.err (!%p489_p3)  }
  0x6d   : > { %s493_s8 = scalar_lea.vmem %s115_s17, 16  ;;  %p498_p5 = scmp.lt.s32.totalorder %s115_s17, %s759_s5 }
  0x6e   : > { %p494_p4 = scmp.ne.s32.totalorder %s115_s17, %s493_s8  ;;  %p499_p6 = scmp.lt.s32.totalorder %s783_s4, %s493_s8 }
  0x70   : > { %p500_p8 = por %p499_p6, %p498_p5 }
  0x72   : > { %p501_p10 = pnand %p500_p8, %p494_p4 }
  0x74   : > { %504 = shalt.err (!%p501_p10)  }
  0x75   : > { %117 = dma.hbm_to_vmem [thread:$0]  %s104_s13, 16, %s115_s17, [#allocation3 + $0x3] }
  0x76   : > { %s343_s11 = sshll.u32 %s119_s18, 4  ;;  %s681_s24 = smov [#allocation2 + $0x5]  }
  0x77   : > { %s121_s23 = scalar_lea.hbm %s928_s1, %s343_s11  ;;  %s148_s3 = sshll.u32 %s681_s24, 4  ;;  %s149_s3 = int_to_ptr.vmem [resolvable:$true] %s148_s3 }
  0x78   : > { %s505_s12 = scalar_lea.hbm %s121_s23, 16  ;;  %p508_p12 = scmp.lt.u32.totalorder %s121_s23, %s928_s1 }
  0x79   : > { %p506_p11 = scmp.ne.s32.totalorder %s121_s23, %s505_s12  ;;  %p509_p13 = scmp.lt.u32.totalorder %s774_s0, %s505_s12 }
  0x7a   : > { %p511_p1 = scmp.lt.u32.totalorder %s505_s12, %s121_s23 }
  0x7b   : > { %p510_p0 = por %p509_p13, %p508_p12 }
  0x7d   : > { %p512_p2 = por %p511_p1, %p510_p0 }
  0x7f   : > { %p513_p3 = pnand %p512_p2, %p506_p11 }
  0x81   : > { %516 = shalt.err (!%p513_p3)  }
  0x82   : > { %s517_s17 = scalar_lea.vmem %s825_s15, 16  ;;  %p522_p5 = scmp.lt.s32.totalorder %s825_s15, %s759_s5 }
  0x83   : > { %p518_p4 = scmp.ne.s32.totalorder %s825_s15, %s517_s17  ;;  %p523_p6 = scmp.lt.s32.totalorder %s783_s4, %s517_s17 }
  0x85   : > { %p524_p8 = por %p523_p6, %p522_p5 }
  0x87   : > { %p525_p10 = pnand %p524_p8, %p518_p4 }
  0x89   : > { %528 = shalt.err (!%p525_p10)  }
  0x8a   : > { %134 = dma.hbm_to_vmem [thread:$0]  %s121_s23, 16, %s825_s15, [#allocation3 + $0x4] }
  0x8b   : > { %s152_s18 = sadd.s32 6, %s751_s29  ;;  %s344_s13 = sshll.u32 %s830_s16, 4 }
  0x8c   : > { %s153_s6 = sld [smem:[#allocation5 + %s152_s18]]  ;;  %s138_s14 = scalar_lea.hbm %s928_s1, %s344_s13 }
  0x8d   : > { %s529_s7 = scalar_lea.hbm %s138_s14, 16  ;;  %p532_p12 = scmp.lt.u32.totalorder %s138_s14, %s928_s1 }
  0x8e   : > { %p530_p11 = scmp.ne.s32.totalorder %s138_s14, %s529_s7  ;;  %p533_p13 = scmp.lt.u32.totalorder %s774_s0, %s529_s7 }
  0x8f   : > { %p535_p1 = scmp.lt.u32.totalorder %s529_s7, %s138_s14 }
  0x90   : > { %p534_p0 = por %p533_p13, %p532_p12 }
  0x92   : > { %p536_p2 = por %p535_p1, %p534_p0 }
  0x94   : > { %p537_p3 = pnand %p536_p2, %p530_p11 }
  0x96   : > { %540 = shalt.err (!%p537_p3)  }
  0x97   : > { %s541_s15 = scalar_lea.vmem %s149_s3, 16  ;;  %p546_p5 = scmp.lt.s32.totalorder %s149_s3, %s759_s5 }
  0x98   : > { %p542_p4 = scmp.ne.s32.totalorder %s149_s3, %s541_s15  ;;  %p547_p6 = scmp.lt.s32.totalorder %s783_s4, %s541_s15 }
  0x9a   : > { %p548_p8 = por %p547_p6, %p546_p5 }
  0x9c   : > { %p549_p10 = pnand %p548_p8, %p542_p4 }
  0x9e   : > { %552 = shalt.err (!%p549_p10)  }
  0x9f   : > { %151 = dma.hbm_to_vmem [thread:$0]  %s138_s14, 16, %s149_s3, [#allocation3 + $0x5] }
  0xa0   : > { %s682_s16 = smov [#allocation2 + $0x6]   ;;  %s169_s10 = sadd.s32 7, %s751_s29 }
  0xa1   : > { %s165_s23 = sshll.u32 %s682_s16, 4  ;;  %s170_s9 = sld [smem:[#allocation5 + %s169_s10]]  ;;  %s166_s23 = int_to_ptr.vmem [resolvable:$true] %s165_s23 }
  0xa2   : > { %s345_s17 = sshll.u32 %s153_s6, 4  ;;  %s683_s18 = smov [#allocation2 + $0x7]  }
  0xa3   : > { %s182_s13 = sshll.u32 %s683_s18, 4  ;;  %s155_s7 = scalar_lea.hbm %s928_s1, %s345_s17  ;;  %s183_s13 = int_to_ptr.vmem [resolvable:$true] %s182_s13 }
  0xa4   : > { %s553_s24 = scalar_lea.hbm %s155_s7, 16  ;;  %p556_p12 = scmp.lt.u32.totalorder %s155_s7, %s928_s1 }
  0xa5   : > { %p554_p11 = scmp.ne.s32.totalorder %s155_s7, %s553_s24  ;;  %p557_p13 = scmp.lt.u32.totalorder %s774_s0, %s553_s24 }
  0xa6   : > { %p559_p1 = scmp.lt.u32.totalorder %s553_s24, %s155_s7 }
  0xa7   : > { %p558_p0 = por %p557_p13, %p556_p12 }
  0xa9   : > { %p560_p2 = por %p559_p1, %p558_p0 }
  0xab   : > { %p561_p3 = pnand %p560_p2, %p554_p11 }
  0xad   : > { %564 = shalt.err (!%p561_p3)  }
  0xae   : > { %s565_s29 = scalar_lea.vmem %s166_s23, 16  ;;  %p570_p5 = scmp.lt.s32.totalorder %s166_s23, %s759_s5 }
  0xaf   : > { %p566_p4 = scmp.ne.s32.totalorder %s166_s23, %s565_s29  ;;  %p571_p6 = scmp.lt.s32.totalorder %s783_s4, %s565_s29 }
  0xb1   : > { %p572_p8 = por %p571_p6, %p570_p5 }
  0xb3   : > { %p573_p10 = pnand %p572_p8, %p566_p4 }
  0xb5   : > { %576 = shalt.err (!%p573_p10)  }
  0xb6   : > { %168 = dma.hbm_to_vmem [thread:$0]  %s155_s7, 16, %s166_s23, [#allocation3 + $0x6] }
  0xb7   : > { %s346_s3 = sshll.u32 %s170_s9, 4 }
  0xb8   : > { %s172_s16 = scalar_lea.hbm %s928_s1, %s346_s3 }
  0xb9   : > { %s577_s10 = scalar_lea.hbm %s172_s16, 16  ;;  %p580_p12 = scmp.lt.u32.totalorder %s172_s16, %s928_s1 }
  0xba   : > { %p578_p11 = scmp.ne.s32.totalorder %s172_s16, %s577_s10  ;;  %p581_p13 = scmp.lt.u32.totalorder %s774_s0, %s577_s10 }
  0xbb   : > { %p583_p1 = scmp.lt.u32.totalorder %s577_s10, %s172_s16 }
  0xbc   : > { %p582_p0 = por %p581_p13, %p580_p12 }
  0xbe   : > { %p584_p2 = por %p583_p1, %p582_p0 }
  0xc0   : > { %p585_p3 = pnand %p584_p2, %p578_p11 }
  0xc2   : > { %588 = shalt.err (!%p585_p3)  }
  0xc3   : > { %s589_s23 = scalar_lea.vmem %s183_s13, 16  ;;  %p594_p5 = scmp.lt.s32.totalorder %s183_s13, %s759_s5 }
  0xc4   : > { %p590_p4 = scmp.ne.s32.totalorder %s183_s13, %s589_s23  ;;  %p595_p6 = scmp.lt.s32.totalorder %s783_s4, %s589_s23 }
  0xc6   : > { %p596_p8 = por %p595_p6, %p594_p5 }
  0xc8   : > { %p597_p10 = pnand %p596_p8, %p590_p4 }
  0xca   : > { %600 = shalt.err (!%p597_p10)  }
  0xcb   : > { %185 = dma.hbm_to_vmem [thread:$0]  %s172_s16, 16, %s183_s13, [#allocation3 + $0x7] }
  0xcc   : > { %s51_s9 = scalar_lea.vmem [#allocation6], %s755_s30 }
  0xcd   : > { %643 = dma.done.wait [#allocation3], 16 }
  0xce   : > { %644 = vsyncadd [#allocation3], 4294967280 }
  0xcf   : > { %645 = dma.done.wait [#allocation3 + $0x1], 16 }
  0xd0   : > { %646 = vsyncadd [#allocation3 + $0x1], 4294967280 }
  0xd1   : > { %647 = dma.done.wait [#allocation3 + $0x2], 16 }
  0xd2   : > { %648 = vsyncadd [#allocation3 + $0x2], 4294967280 }
  0xd3   : > { %649 = dma.done.wait [#allocation3 + $0x3], 16 }
  0xd4   : > { %650 = vsyncadd [#allocation3 + $0x3], 4294967280 }
  0xd5   : > { %651 = dma.done.wait [#allocation3 + $0x4], 16 }
  0xd6   : > { %652 = vsyncadd [#allocation3 + $0x4], 4294967280 }
  0xd7   : > { %653 = dma.done.wait [#allocation3 + $0x5], 16 }
  0xd8   : > { %654 = vsyncadd [#allocation3 + $0x5], 4294967280 }
  0xd9   : > { %655 = dma.done.wait [#allocation3 + $0x6], 16 }
  0xda   : > { %656 = vsyncadd [#allocation3 + $0x6], 4294967280 }
  0xdb   : > { %657 = dma.done.wait [#allocation3 + $0x7], 16 }
  0xdc   : > { %658 = vsyncadd [#allocation3 + $0x7], 4294967280  ;;  %s348_s30 = sshll.u32 %s673_s21, 7  ;;  %s220_s5 = sshll.u32 %s51_s9, 4  ;;  %v203_v0 = vld [vmem:[#allocation2] sm:$0xff]  ;;  %s888_s5 = int_to_ptr.vmem [resolvable:$true] %s220_s5 }
  0xdd   : > { %v204_v1 = vmul.f32 11.313708, %v203_v0  ;;  %s886_s13 = scalar_lea.hbm %s929_s2, %s348_s30  ;;  %s207_s8 = scalar_lea.sflag [#allocation7], %s49_s28 }
  0xde   : > { %s601_s11 = scalar_lea.vmem %s888_s5, 128  ;;  %s684_s7 = smov [#allocation6]  }
  0xdf   : > { %205 = vst [vmem:[%s51_s9] sm:$0xff] %v204_v1  ;;  %p602_p11 = scmp.ne.s32.totalorder %s888_s5, %s601_s11  ;;  %s605_s24 = sshll.u32 %s684_s7, 4  ;;  %s606_s24 = int_to_ptr.vmem [resolvable:$false] %s605_s24 }
  0xe0   : > { %s607_s12 = scalar_lea.vmem %s606_s24, 256  ;;  %p608_p0 = scmp.lt.s32.totalorder %s888_s5, %s606_s24 }
  0xe1   : > { %p603_p12 = pnand %p602_p11, %p740_p7  ;;  %p609_p1 = scmp.lt.s32.totalorder %s607_s12, %s601_s11 }
  0xe3   : > { %p604_p13 = pneg %p603_p12  ;;  %p610_p2 = por %p609_p1, %p608_p0 }
  0xe5   : > { %p611_p3 = pnand %p610_p2, %p604_p13 }
  0xe7   : > { %614 = shalt.err (!%p611_p3)
}
  0xe8   : > { %s615_s28 = scalar_lea.hbm %s886_s13, 128  ;;  %s619_s3 = scalar_lea.hbm %s929_s2, 256 }
  0xe9   : > { %p616_p4 = scmp.ne.s32.totalorder %s886_s13, %s615_s28  ;;  %p620_p8 = scmp.lt.u32.totalorder %s886_s13, %s929_s2 }
  0xea   : > { %p621_p10 = scmp.lt.u32.totalorder %s619_s3, %s615_s28  ;;  %p623_p12 = scmp.lt.u32.totalorder %s615_s28, %s886_s13 }
  0xeb   : > { %p617_p5 = pnand %p616_p4, %p740_p7 }
  0xec   : > { %p622_p11 = por %p621_p10, %p620_p8 }
  0xed   : > { %p618_p6 = pneg %p617_p5 }
  0xee   : > { %p624_p13 = por %p623_p12, %p622_p11 }
  0xf0   : > { %p625_p0 = pnand %p624_p13, %p618_p6 }
  0xf2   : > { %628 = shalt.err (!%p625_p0)
}
  0xf3   : > { %359 = dma.vmem_to_hbm [thread:$0]  (%p740_p7), %s888_s5, 128, %s886_s13, %s207_s8  }
  0xf4 PF: > { %p365_p1 = scmp.ge.s32.totalorder %s673_s21, 1  ;;  %s232_s16 = sand.u32 1, %s665_s19  }
  0xf5   : > { %s233_s10 = scalar_lea.sflag [#allocation7], %s232_s16 }
  0xf6   : > { %p362_p2 = pnand %p365_p1, %p744_p9 }
  0xf8   : > { %660 = dma.done.wait (!%p362_p2), %s233_s10, 128  }
  0xf9   : > { %662 = vsyncadd (!%p362_p2), %s233_s10, 4294967168  ;;  %p16_p3 = scmp.ge.s32.totalorder %s729_s22, 3   ;;  %s932_s19 = smov %s669_s20 }
  0xfa   : > { %s933_s20 = smov %s738_s25  ;;  %s934_s21 = smov %s729_s22 }
  0xfb   :  { %18 = sbr.rel (!%p16_p3) target bundleno = 15 (0xf), region = 105 }
 0x102   :  { %238 = vsyncpa [#allocation7], 1 }
 0x103   :  { %240 = vsyncpa [#allocation7 + $0x1], 1 }
 0x104   :  { %241 = vsyncmov [#allocation3] }
 0x107   :  { %s242_s21 = vpop.sfrf %241 }
 0x108   :  { %p351_p7 = scmp.ne.s32.totalorder %s242_s21, 0 }
 0x10a   :  { %246 = shalt.err (%p351_p7)  }
 0x10b   :  { %248 = vsyncmov [#allocation3 + $0x1] }
 0x10e   :  { %s249_s26 = vpop.sfrf %248 }
 0x10f   :  { %p352_p9 = scmp.ne.s32.totalorder %s249_s26, 0 }
 0x111   :  { %253 = shalt.err (%p352_p9)  }
 0x112   :  { %255 = vsyncmov [#allocation3 + $0x2] }
 0x115   :  { %s256_s27 = vpop.sfrf %255 }
 0x116   :  { %p353_p4 = scmp.ne.s32.totalorder %s256_s27, 0 }
 0x118   :  { %260 = shalt.err (%p353_p4)  }
 0x119   :  { %262 = vsyncmov [#allocation3 + $0x3] }
 0x11c   :  { %s263_s17 = vpop.sfrf %262 }
 0x11d   :  { %p354_p5 = scmp.ne.s32.totalorder %s263_s17, 0 }
 0x11f   :  { %267 = shalt.err (%p354_p5)  }
 0x120   :  { %269 = vsyncmov [#allocation3 + $0x4] }
 0x123   :  { %s270_s22 = vpop.sfrf %269 }
 0x124   :  { %p355_p6 = scmp.ne.s32.totalorder %s270_s22, 0 }
 0x126   :  { %274 = shalt.err (%p355_p6)  }
 0x127   :  { %276 = vsyncmov [#allocation3 + $0x5] }
 0x12a   :  { %s277_s1 = vpop.sfrf %276 }
 0x12b   :  { %p356_p8 = scmp.ne.s32.totalorder %s277_s1, 0 }
 0x12d   :  { %281 = shalt.err (%p356_p8)  }
 0x12e   :  { %283 = vsyncmov [#allocation3 + $0x6] }
 0x131   :  { %s284_s2 = vpop.sfrf %283 }
 0x132   :  { %p357_p10 = scmp.ne.s32.totalorder %s284_s2, 0 }
 0x134   :  { %288 = shalt.err (%p357_p10)  }
 0x135   :  { %290 = vsyncmov [#allocation3 + $0x7] }
 0x138   :  { %s291_s19 = vpop.sfrf %290 }
 0x139   :  { %p358_p11 = scmp.ne.s32.totalorder %s291_s19, 0 }
 0x13b   :  { %295 = shalt.err (%p358_p11)  }

</bundles_post_ra>
